<compile_context>
chip_gen: v7x
topology: tpu7x:2x2x1
jax: 0.10.0
libtpu: 0.0.40
codegen_flags: <defaults>
</compile_context>

<pallas_src>
import jax
import jax.numpy as jnp
from jax import lax
from jax.experimental import pallas as pl
from jax.experimental.pallas import tpu as pltpu

HIDDEN = 32
GATES = 4 * HIDDEN  # 128

# Row offsets inside the packed parameter slab (rows x 128 lanes, float32).
_R_WHH = 0      # [  0: 32)  LSTM w_hh^T, i/f/o cols pre-scaled by 0.5   (32, 128)
_R_W1 = 32      # [ 32: 64)  fused head W1 = [a_w1 | c_w1]               (32, 128)
_R_W2 = 64      # [ 64:192)  fused head W2 (block-diag, lane-padded)     (128, 128)
_R_W3 = 192     # [192:320)  fused head W3 (block-diag, lane-padded)     (128, 128)
_R_WIH = 320    # [320:321)  LSTM w_ih^T, pre-scaled                     (1, 128)
_R_BL = 321     # [321:322)  b_ih + b_hh, pre-scaled                     (1, 128)
_R_B1 = 322     # [322:323)  fused head b1                               (1, 128)
_R_B2 = 323     # [323:324)  fused head b2 (lane-padded)                 (1, 128)
_R_B3 = 324     # [324:325)  fused head b3 (lane-padded)                 (1, 128)
SLAB_ROWS = 325


def fame_kernel(x_ref, len_ref, slab_ref, out_ref):
    # x_ref:    (B, T)    f32  padded sequences (batch-major, no wrapper transpose)
    # len_ref:  (B, 1)    i32
    # slab_ref: (325,128) f32  all parameters packed into one VMEM slab
    # out_ref:  (B, 128)  f32  lane 0 = actor, lane 1 = critic (lane-dense store)
    B, T = x_ref.shape
    H = HIDDEN

    lengths = len_ref[...]                               # (B, 1) int32

    # --- LSTM parameters (static row slices of the slab; loaded once) ---
    # i/f/o gate columns of these rows were pre-scaled by 0.5 host-side, so a
    # single tanh gives sigmoid via 0.5*tanh + 0.5.
    w_hh = slab_ref[_R_WHH:_R_WHH + H, :]                # (32, 128)
    w_ih = slab_ref[_R_WIH:_R_WIH + 1, :]                # (1, 128)
    b_l = slab_ref[_R_BL:_R_BL + 1, :]                   # (1, 128)

    xv = x_ref[...]                                      # (B, T)

    h = jnp.zeros((B, H), jnp.float32)
    c = jnp.zeros((B, H), jnp.float32)

    # T = 9 fixed: fully unrolled (static t -> static slices, no scratch).
    for t in range(T):
        # Carry-independent input contribution: scheduler hoists/overlaps it.
        pre_t = xv[:, t:t + 1] * w_ih + b_l              # (B, 128)
        gates = pre_t + jnp.dot(h, w_hh, preferred_element_type=jnp.float32)
        th = jnp.tanh(gates)                             # EUP push #1 (full vreg)
        sg = 0.5 * th + 0.5                              # sigmoid(z)=0.5*tanh(z/2)+0.5 (VPU)
        i_g = sg[:, 0 * H:1 * H]
        f_g = sg[:, 1 * H:2 * H]
        g_g = th[:, 2 * H:3 * H]                         # g gate columns were NOT pre-scaled
        o_g = sg[:, 3 * H:4 * H]
        c_new = f_g * c + i_g * g_g
        h_new = o_g * jnp.tanh(c_new)                    # EUP push #2
        # Emulate pack_padded_sequence + hidden[-1]: freeze state once t >= length[b].
        valid = t < lengths                              # (B, 1)
        h = jnp.where(valid, h_new, h)
        c = jnp.where(valid, c_new, c)

    # --- fused actor + critic head (block-diagonal weights, lane-padded to 128) ---
    # Loaded after the recurrence so they are not live across the serial loop.
    w1 = slab_ref[_R_W1:_R_W1 + 32, :]                   # (32, 128)
    w2 = slab_ref[_R_W2:_R_W2 + 128, :]                  # (128, 128)
    w3 = slab_ref[_R_W3:_R_W3 + 128, :]                  # (128, 128)
    b1 = slab_ref[_R_B1:_R_B1 + 1, :]                    # (1, 128)
    b2 = slab_ref[_R_B2:_R_B2 + 1, :]                    # (1, 128)
    b3 = slab_ref[_R_B3:_R_B3 + 1, :]                    # (1, 128)

    z1 = jnp.maximum(jnp.dot(h, w1, preferred_element_type=jnp.float32) + b1, 0.0)   # (B, 128)
    z2 = jnp.maximum(jnp.dot(z1, w2, preferred_element_type=jnp.float32) + b2, 0.0)  # (B, 128)
    out = jnp.dot(z2, w3, preferred_element_type=jnp.float32) + b3                   # (B, 128)

    out_ref[...] = out                                   # single unmasked full-lane store


def pack_params(p):
    """Fuse actor/critic MLPs (block-diagonal), pre-scale i/f/o gate columns by 0.5,
    and pack everything into one (325, 128) f32 slab (single weight DMA)."""
    f32 = jnp.float32
    H = HIDDEN

    # Gate order (PyTorch LSTM): [i | f | g | o].  Scale i/f/o columns by 0.5 so
    # the kernel can compute sigmoid from a single tanh push.
    scale = jnp.ones((1, GATES), f32)
    scale = scale.at[:, 0:2 * H].set(0.5)       # i, f
    scale = scale.at[:, 3 * H:4 * H].set(0.5)   # o

    w_hh_s = p["w_hh_t"] * scale
    w_ih_s = p["w_ih_t"] * scale
    b_l_s = (p["b_ih"] + p["b_hh"]) * scale

    # Fused layer 1: z1 = [actor_z1 | critic_z1]  -> (32, 128)
    w1 = jnp.concatenate([p["a_w1"], p["c_w1"]], axis=1)
    b1 = jnp.concatenate([p["a_b1"], p["c_b1"]], axis=1)

    # Fused layer 2 (block diagonal), lane-padded to 128.
    w2 = jnp.zeros((128, 128), f32)
    w2 = w2.at[0:64, 0:32].set(p["a_w2"])
    w2 = w2.at[64:128, 32:64].set(p["c_w2"])
    b2 = jnp.zeros((1, 128), f32)
    b2 = b2.at[:, 0:32].set(p["a_b2"])
    b2 = b2.at[:, 32:64].set(p["c_b2"])

    # Fused layer 3 (block diagonal), lane-padded to 128: lane0=actor, lane1=critic.
    w3 = jnp.zeros((128, 128), f32)
    w3 = w3.at[0:32, 0:1].set(p["a_w3"])
    w3 = w3.at[32:64, 1:2].set(p["c_w3"])
    b3 = jnp.zeros((1, 128), f32)
    b3 = b3.at[:, 0:1].set(p["a_b3"])
    b3 = b3.at[:, 1:2].set(p["c_b3"])

    slab = jnp.concatenate([
        w_hh_s,                    # rows   0: 32
        w1,                        # rows  32: 64
        w2,                        # rows  64:192
        w3,                        # rows 192:320
        w_ih_s,                    # row  320
        b_l_s,                     # row  321  (pre-summed, pre-scaled bias)
        b1,                        # row  322
        b2,                        # row  323
        b3,                        # row  324
    ], axis=0).astype(f32)
    assert slab.shape == (SLAB_ROWS, GATES)
    return {"slab": slab}


def fame_predictor(x, lengths, packed):
    B, T = x.shape
    lengths2 = lengths.reshape(B, 1).astype(jnp.int32)

    vspec = pl.BlockSpec(memory_space=pltpu.MemorySpace.VMEM)
    out = pl.pallas_call(
        fame_kernel,
        out_shape=jax.ShapeDtypeStruct((B, GATES), jnp.float32),
        in_specs=[vspec, vspec, vspec],
        out_specs=vspec,
    )(x.astype(jnp.float32), lengths2, packed["slab"])
    # Lane 0 = actor head, lane 1 = critic head (sliced outside the kernel so
    # the kernel store stays lane-dense).
    return out[:, 0:1], out[:, 1:2]


def init_params(key):
    """Deterministic init mirroring PyTorch default U(-1/sqrt(fan_in), 1/sqrt(fan_in))."""
    H = HIDDEN
    ks = jax.random.split(key, 16)

    def u(k, shape, bound):
        return jax.random.uniform(k, shape, jnp.float32, -bound, bound)

    lb = 1.0 / float(jnp.sqrt(jnp.float32(H)))
    params = dict(
        w_ih_t=u(ks[0], (1, 4 * H), lb),   # transpose of torch weight_ih_l0 (4H, 1)
        w_hh_t=u(ks[1], (H, 4 * H), lb),   # transpose of torch weight_hh_l0 (4H, H)
        b_ih=u(ks[2], (1, 4 * H), lb),
        b_hh=u(ks[3], (1, 4 * H), lb),
    )

    def linear(kw, kb, fan_in, fan_out):
        bound = 1.0 / float(jnp.sqrt(jnp.float32(fan_in)))
        return u(kw, (fan_in, fan_out), bound), u(kb, (1, fan_out), bound)

    params["a_w1"], params["a_b1"] = linear(ks[4], ks[5], H, 64)
    params["a_w2"], params["a_b2"] = linear(ks[6], ks[7], 64, H)
    params["a_w3"], params["a_b3"] = linear(ks[8], ks[9], H, 1)
    params["c_w1"], params["c_b1"] = linear(ks[10], ks[11], H, 64)
    params["c_w2"], params["c_b2"] = linear(ks[12], ks[13], 64, H)
    params["c_w3"], params["c_b3"] = linear(ks[14], ks[15], H, 1)
    return params


def reference_forward(x, lengths, p):
    """Pure-JAX reference of the same math on the UNFUSED, UNSCALED params."""
    B, T = x.shape
    H = HIDDEN
    hp = lax.Precision.HIGHEST
    h = jnp.zeros((B, H), jnp.float32)
    c = jnp.zeros((B, H), jnp.float32)
    b = p["b_ih"] + p["b_hh"]
    for t in range(T):
        x_t = x[:, t:t + 1]
        gates = x_t * p["w_ih_t"] + jnp.dot(h, p["w_hh_t"], precision=hp) + b
        i = jax.nn.sigmoid(gates[:, 0 * H:1 * H])
        f = jax.nn.sigmoid(gates[:, 1 * H:2 * H])
        g = jnp.tanh(gates[:, 2 * H:3 * H])
        o = jax.nn.sigmoid(gates[:, 3 * H:4 * H])
        c_new = f * c + i * g
        h_new = o * jnp.tanh(c_new)
        valid = (t < lengths).reshape(B, 1)
        h = jnp.where(valid, h_new, h)
        c = jnp.where(valid, c_new, c)

    def mlp(hh, w1, b1, w2, b2, w3, b3):
        z1 = jnp.maximum(jnp.dot(hh, w1, precision=hp) + b1, 0.0)
        z2 = jnp.maximum(jnp.dot(z1, w2, precision=hp) + b2, 0.0)
        return jnp.dot(z2, w3, precision=hp) + b3

    a = mlp(h, p["a_w1"], p["a_b1"], p["a_w2"], p["a_b2"], p["a_w3"], p["a_b3"])
    cr = mlp(h, p["c_w1"], p["c_b1"], p["c_w2"], p["c_b2"], p["c_w3"], p["c_b3"])
    return a, cr


if __name__ == "__main__":
    key = jax.random.PRNGKey(0)
    k_param, k_x = jax.random.split(key)

    B, T = 2, 9                      # max_seq_length = 9
    params = init_params(k_param)
    packed = pack_params(params)
    x = jax.random.normal(k_x, (B, T), jnp.float32)
    lengths = jnp.array([9, 5], dtype=jnp.int32)   # padded sequences of different length

    actor_out, critic_out = fame_predictor(x, lengths, packed)
    jax.block_until_ready((actor_out, critic_out))

    a_ref, c_ref = reference_forward(x, lengths, params)
    assert actor_out.shape == (B, 1) and critic_out.shape == (B, 1)
    assert float(jnp.max(jnp.abs(actor_out - a_ref))) < 2e-3
    assert float(jnp.max(jnp.abs(critic_out - c_ref))) < 2e-3

    print("KERNEL_OK")
</pallas_src>

<mosaic_0001>
module attributes {stable_mosaic.version = 11 : i64} {
  func.func @fame_kernel(%arg0: memref<2x9xf32, #tpu.memory_space<vmem>>, %arg1: memref<2x1xi32, #tpu.memory_space<vmem>>, %arg2: memref<325x128xf32, #tpu.memory_space<vmem>>, %arg3: memref<2x128xf32, #tpu.memory_space<vmem>>) attributes {dimension_semantics = [], scalar_prefetch = 0 : i64, scratch_operands = 0 : i64, tpu.core_type = #tpu.core_type<tc>} {
    %c0 = arith.constant 0 : index
    %c0_0 = arith.constant 0 : index
    %0 = vector.load %arg1[%c0, %c0_0] : memref<2x1xi32, #tpu.memory_space<vmem>>, vector<2x1xi32>
    %c0_1 = arith.constant 0 : index
    %c0_2 = arith.constant 0 : index
    %1 = vector.load %arg2[%c0_1, %c0_2] : memref<325x128xf32, #tpu.memory_space<vmem>>, vector<32x128xf32>
    %c320 = arith.constant 320 : index
    %c0_3 = arith.constant 0 : index
    %2 = vector.load %arg2[%c320, %c0_3] : memref<325x128xf32, #tpu.memory_space<vmem>>, vector<1x128xf32>
    %c321 = arith.constant 321 : index
    %c0_4 = arith.constant 0 : index
    %3 = vector.load %arg2[%c321, %c0_4] : memref<325x128xf32, #tpu.memory_space<vmem>>, vector<1x128xf32>
    %c0_5 = arith.constant 0 : index
    %c0_6 = arith.constant 0 : index
    %4 = vector.load %arg0[%c0_5, %c0_6] : memref<2x9xf32, #tpu.memory_space<vmem>>, vector<2x9xf32>
    %cst = arith.constant 0.000000e+00 : f32
    %5 = vector.broadcast %cst : f32 to vector<2x32xf32>
    %cst_7 = arith.constant 0.000000e+00 : f32
    %6 = vector.broadcast %cst_7 : f32 to vector<2x32xf32>
    %7 = vector.extract_strided_slice %4 {offsets = [0, 0], sizes = [2, 1], strides = [1, 1]} : vector<2x9xf32> to vector<2x1xf32>
    %8 = vector.broadcast %7 : vector<2x1xf32> to vector<2x128xf32>
    %9 = vector.broadcast %2 : vector<1x128xf32> to vector<2x128xf32>
    %10 = arith.mulf %8, %9 : vector<2x128xf32>
    %11 = vector.broadcast %3 : vector<1x128xf32> to vector<2x128xf32>
    %12 = arith.addf %10, %11 : vector<2x128xf32>
    %cst_8 = arith.constant dense<0.000000e+00> : vector<2x128xf32>
    %13 = tpu.matmul %5, %1, %cst_8 {dimension_numbers = #tpu.dot_dimension_numbers<[1], [0], [0], [1], [0, 0, 1, 1], [], []>} : vector<2x32xf32>, vector<32x128xf32>, vector<2x128xf32> -> vector<2x128xf32>
    %14 = arith.addf %12, %13 : vector<2x128xf32>
    %15 = math.tanh %14 : vector<2x128xf32>
    %cst_9 = arith.constant 5.000000e-01 : f32
    %16 = vector.broadcast %cst_9 : f32 to vector<2x128xf32>
    %17 = arith.mulf %16, %15 : vector<2x128xf32>
    %cst_10 = arith.constant 5.000000e-01 : f32
    %18 = vector.broadcast %cst_10 : f32 to vector<2x128xf32>
    %19 = arith.addf %17, %18 : vector<2x128xf32>
    %20 = vector.extract_strided_slice %19 {offsets = [0, 0], sizes = [2, 32], strides = [1, 1]} : vector<2x128xf32> to vector<2x32xf32>
    %21 = vector.extract_strided_slice %19 {offsets = [0, 32], sizes = [2, 32], strides = [1, 1]} : vector<2x128xf32> to vector<2x32xf32>
    %22 = vector.extract_strided_slice %15 {offsets = [0, 64], sizes = [2, 32], strides = [1, 1]} : vector<2x128xf32> to vector<2x32xf32>
    %23 = vector.extract_strided_slice %19 {offsets = [0, 96], sizes = [2, 32], strides = [1, 1]} : vector<2x128xf32> to vector<2x32xf32>
    %24 = arith.mulf %21, %6 : vector<2x32xf32>
    %25 = arith.mulf %20, %22 : vector<2x32xf32>
    %26 = arith.addf %24, %25 : vector<2x32xf32>
    %27 = math.tanh %26 : vector<2x32xf32>
    %28 = arith.mulf %23, %27 : vector<2x32xf32>
    %c0_i32 = arith.constant 0 : i32
    %29 = vector.broadcast %c0_i32 : i32 to vector<2x1xi32>
    %30 = arith.cmpi sgt, %0, %29 : vector<2x1xi32>
    %31 = vector.shape_cast %30 : vector<2x1xi1> to vector<2x1xi1>
    %32 = vector.broadcast %31 : vector<2x1xi1> to vector<2x32xi1>
    %33 = arith.select %32, %28, %5 : vector<2x32xi1>, vector<2x32xf32>
    %34 = vector.shape_cast %30 : vector<2x1xi1> to vector<2x1xi1>
    %35 = vector.broadcast %34 : vector<2x1xi1> to vector<2x32xi1>
    %36 = arith.select %35, %26, %6 : vector<2x32xi1>, vector<2x32xf32>
    %37 = vector.extract_strided_slice %4 {offsets = [0, 1], sizes = [2, 1], strides = [1, 1]} : vector<2x9xf32> to vector<2x1xf32>
    %38 = vector.broadcast %37 : vector<2x1xf32> to vector<2x128xf32>
    %39 = vector.broadcast %2 : vector<1x128xf32> to vector<2x128xf32>
    %40 = arith.mulf %38, %39 : vector<2x128xf32>
    %41 = vector.broadcast %3 : vector<1x128xf32> to vector<2x128xf32>
    %42 = arith.addf %40, %41 : vector<2x128xf32>
    %cst_11 = arith.constant dense<0.000000e+00> : vector<2x128xf32>
    %43 = tpu.matmul %33, %1, %cst_11 {dimension_numbers = #tpu.dot_dimension_numbers<[1], [0], [0], [1], [0, 0, 1, 1], [], []>} : vector<2x32xf32>, vector<32x128xf32>, vector<2x128xf32> -> vector<2x128xf32>
    %44 = arith.addf %42, %43 : vector<2x128xf32>
    %45 = math.tanh %44 : vector<2x128xf32>
    %cst_12 = arith.constant 5.000000e-01 : f32
    %46 = vector.broadcast %cst_12 : f32 to vector<2x128xf32>
    %47 = arith.mulf %46, %45 : vector<2x128xf32>
    %cst_13 = arith.constant 5.000000e-01 : f32
    %48 = vector.broadcast %cst_13 : f32 to vector<2x128xf32>
    %49 = arith.addf %47, %48 : vector<2x128xf32>
    %50 = vector.extract_strided_slice %49 {offsets = [0, 0], sizes = [2, 32], strides = [1, 1]} : vector<2x128xf32> to vector<2x32xf32>
    %51 = vector.extract_strided_slice %49 {offsets = [0, 32], sizes = [2, 32], strides = [1, 1]} : vector<2x128xf32> to vector<2x32xf32>
    %52 = vector.extract_strided_slice %45 {offsets = [0, 64], sizes = [2, 32], strides = [1, 1]} : vector<2x128xf32> to vector<2x32xf32>
    %53 = vector.extract_strided_slice %49 {offsets = [0, 96], sizes = [2, 32], strides = [1, 1]} : vector<2x128xf32> to vector<2x32xf32>
    %54 = arith.mulf %51, %36 : vector<2x32xf32>
    %55 = arith.mulf %50, %52 : vector<2x32xf32>
    %56 = arith.addf %54, %55 : vector<2x32xf32>
    %57 = math.tanh %56 : vector<2x32xf32>
    %58 = arith.mulf %53, %57 : vector<2x32xf32>
    %c1_i32 = arith.constant 1 : i32
    %59 = vector.broadcast %c1_i32 : i32 to vector<2x1xi32>
    %60 = arith.cmpi sgt, %0, %59 : vector<2x1xi32>
    %61 = vector.shape_cast %60 : vector<2x1xi1> to vector<2x1xi1>
    %62 = vector.broadcast %61 : vector<2x1xi1> to vector<2x32xi1>
    %63 = arith.select %62, %58, %33 : vector<2x32xi1>, vector<2x32xf32>
    %64 = vector.shape_cast %60 : vector<2x1xi1> to vector<2x1xi1>
    %65 = vector.broadcast %64 : vector<2x1xi1> to vector<2x32xi1>
    %66 = arith.select %65, %56, %36 : vector<2x32xi1>, vector<2x32xf32>
    %67 = vector.extract_strided_slice %4 {offsets = [0, 2], sizes = [2, 1], strides = [1, 1]} : vector<2x9xf32> to vector<2x1xf32>
    %68 = vector.broadcast %67 : vector<2x1xf32> to vector<2x128xf32>
    %69 = vector.broadcast %2 : vector<1x128xf32> to vector<2x128xf32>
    %70 = arith.mulf %68, %69 : vector<2x128xf32>
    %71 = vector.broadcast %3 : vector<1x128xf32> to vector<2x128xf32>
    %72 = arith.addf %70, %71 : vector<2x128xf32>
    %cst_14 = arith.constant dense<0.000000e+00> : vector<2x128xf32>
    %73 = tpu.matmul %63, %1, %cst_14 {dimension_numbers = #tpu.dot_dimension_numbers<[1], [0], [0], [1], [0, 0, 1, 1], [], []>} : vector<2x32xf32>, vector<32x128xf32>, vector<2x128xf32> -> vector<2x128xf32>
    %74 = arith.addf %72, %73 : vector<2x128xf32>
    %75 = math.tanh %74 : vector<2x128xf32>
    %cst_15 = arith.constant 5.000000e-01 : f32
    %76 = vector.broadcast %cst_15 : f32 to vector<2x128xf32>
    %77 = arith.mulf %76, %75 : vector<2x128xf32>
    %cst_16 = arith.constant 5.000000e-01 : f32
    %78 = vector.broadcast %cst_16 : f32 to vector<2x128xf32>
    %79 = arith.addf %77, %78 : vector<2x128xf32>
    %80 = vector.extract_strided_slice %79 {offsets = [0, 0], sizes = [2, 32], strides = [1, 1]} : vector<2x128xf32> to vector<2x32xf32>
    %81 = vector.extract_strided_slice %79 {offsets = [0, 32], sizes = [2, 32], strides = [1, 1]} : vector<2x128xf32> to vector<2x32xf32>
    %82 = vector.extract_strided_slice %75 {offsets = [0, 64], sizes = [2, 32], strides = [1, 1]} : vector<2x128xf32> to vector<2x32xf32>
    %83 = vector.extract_strided_slice %79 {offsets = [0, 96], sizes = [2, 32], strides = [1, 1]} : vector<2x128xf32> to vector<2x32xf32>
    %84 = arith.mulf %81, %66 : vector<2x32xf32>
    %85 = arith.mulf %80, %82 : vector<2x32xf32>
    %86 = arith.addf %84, %85 : vector<2x32xf32>
    %87 = math.tanh %86 : vector<2x32xf32>
    %88 = arith.mulf %83, %87 : vector<2x32xf32>
    %c2_i32 = arith.constant 2 : i32
    %89 = vector.broadcast %c2_i32 : i32 to vector<2x1xi32>
    %90 = arith.cmpi sgt, %0, %89 : vector<2x1xi32>
    %91 = vector.shape_cast %90 : vector<2x1xi1> to vector<2x1xi1>
    %92 = vector.broadcast %91 : vector<2x1xi1> to vector<2x32xi1>
    %93 = arith.select %92, %88, %63 : vector<2x32xi1>, vector<2x32xf32>
    %94 = vector.shape_cast %90 : vector<2x1xi1> to vector<2x1xi1>
    %95 = vector.broadcast %94 : vector<2x1xi1> to vector<2x32xi1>
    %96 = arith.select %95, %86, %66 : vector<2x32xi1>, vector<2x32xf32>
    %97 = vector.extract_strided_slice %4 {offsets = [0, 3], sizes = [2, 1], strides = [1, 1]} : vector<2x9xf32> to vector<2x1xf32>
    %98 = vector.broadcast %97 : vector<2x1xf32> to vector<2x128xf32>
    %99 = vector.broadcast %2 : vector<1x128xf32> to vector<2x128xf32>
    %100 = arith.mulf %98, %99 : vector<2x128xf32>
    %101 = vector.broadcast %3 : vector<1x128xf32> to vector<2x128xf32>
    %102 = arith.addf %100, %101 : vector<2x128xf32>
    %cst_17 = arith.constant dense<0.000000e+00> : vector<2x128xf32>
    %103 = tpu.matmul %93, %1, %cst_17 {dimension_numbers = #tpu.dot_dimension_numbers<[1], [0], [0], [1], [0, 0, 1, 1], [], []>} : vector<2x32xf32>, vector<32x128xf32>, vector<2x128xf32> -> vector<2x128xf32>
    %104 = arith.addf %102, %103 : vector<2x128xf32>
    %105 = math.tanh %104 : vector<2x128xf32>
    %cst_18 = arith.constant 5.000000e-01 : f32
    %106 = vector.broadcast %cst_18 : f32 to vector<2x128xf32>
    %107 = arith.mulf %106, %105 : vector<2x128xf32>
    %cst_19 = arith.constant 5.000000e-01 : f32
    %108 = vector.broadcast %cst_19 : f32 to vector<2x128xf32>
    %109 = arith.addf %107, %108 : vector<2x128xf32>
    %110 = vector.extract_strided_slice %109 {offsets = [0, 0], sizes = [2, 32], strides = [1, 1]} : vector<2x128xf32> to vector<2x32xf32>
    %111 = vector.extract_strided_slice %109 {offsets = [0, 32], sizes = [2, 32], strides = [1, 1]} : vector<2x128xf32> to vector<2x32xf32>
    %112 = vector.extract_strided_slice %105 {offsets = [0, 64], sizes = [2, 32], strides = [1, 1]} : vector<2x128xf32> to vector<2x32xf32>
    %113 = vector.extract_strided_slice %109 {offsets = [0, 96], sizes = [2, 32], strides = [1, 1]} : vector<2x128xf32> to vector<2x32xf32>
    %114 = arith.mulf %111, %96 : vector<2x32xf32>
    %115 = arith.mulf %110, %112 : vector<2x32xf32>
    %116 = arith.addf %114, %115 : vector<2x32xf32>
    %117 = math.tanh %116 : vector<2x32xf32>
    %118 = arith.mulf %113, %117 : vector<2x32xf32>
    %c3_i32 = arith.constant 3 : i32
    %119 = vector.broadcast %c3_i32 : i32 to vector<2x1xi32>
    %120 = arith.cmpi sgt, %0, %119 : vector<2x1xi32>
    %121 = vector.shape_cast %120 : vector<2x1xi1> to vector<2x1xi1>
    %122 = vector.broadcast %121 : vector<2x1xi1> to vector<2x32xi1>
    %123 = arith.select %122, %118, %93 : vector<2x32xi1>, vector<2x32xf32>
    %124 = vector.shape_cast %120 : vector<2x1xi1> to vector<2x1xi1>
    %125 = vector.broadcast %124 : vector<2x1xi1> to vector<2x32xi1>
    %126 = arith.select %125, %116, %96 : vector<2x32xi1>, vector<2x32xf32>
    %127 = vector.extract_strided_slice %4 {offsets = [0, 4], sizes = [2, 1], strides = [1, 1]} : vector<2x9xf32> to vector<2x1xf32>
    %128 = vector.broadcast %127 : vector<2x1xf32> to vector<2x128xf32>
    %129 = vector.broadcast %2 : vector<1x128xf32> to vector<2x128xf32>
    %130 = arith.mulf %128, %129 : vector<2x128xf32>
    %131 = vector.broadcast %3 : vector<1x128xf32> to vector<2x128xf32>
    %132 = arith.addf %130, %131 : vector<2x128xf32>
    %cst_20 = arith.constant dense<0.000000e+00> : vector<2x128xf32>
    %133 = tpu.matmul %123, %1, %cst_20 {dimension_numbers = #tpu.dot_dimension_numbers<[1], [0], [0], [1], [0, 0, 1, 1], [], []>} : vector<2x32xf32>, vector<32x128xf32>, vector<2x128xf32> -> vector<2x128xf32>
    %134 = arith.addf %132, %133 : vector<2x128xf32>
    %135 = math.tanh %134 : vector<2x128xf32>
    %cst_21 = arith.constant 5.000000e-01 : f32
    %136 = vector.broadcast %cst_21 : f32 to vector<2x128xf32>
    %137 = arith.mulf %136, %135 : vector<2x128xf32>
    %cst_22 = arith.constant 5.000000e-01 : f32
    %138 = vector.broadcast %cst_22 : f32 to vector<2x128xf32>
    %139 = arith.addf %137, %138 : vector<2x128xf32>
    %140 = vector.extract_strided_slice %139 {offsets = [0, 0], sizes = [2, 32], strides = [1, 1]} : vector<2x128xf32> to vector<2x32xf32>
    %141 = vector.extract_strided_slice %139 {offsets = [0, 32], sizes = [2, 32], strides = [1, 1]} : vector<2x128xf32> to vector<2x32xf32>
    %142 = vector.extract_strided_slice %135 {offsets = [0, 64], sizes = [2, 32], strides = [1, 1]} : vector<2x128xf32> to vector<2x32xf32>
    %143 = vector.extract_strided_slice %139 {offsets = [0, 96], sizes = [2, 32], strides = [1, 1]} : vector<2x128xf32> to vector<2x32xf32>
    %144 = arith.mulf %141, %126 : vector<2x32xf32>
    %145 = arith.mulf %140, %142 : vector<2x32xf32>
    %146 = arith.addf %144, %145 : vector<2x32xf32>
    %147 = math.tanh %146 : vector<2x32xf32>
    %148 = arith.mulf %143, %147 : vector<2x32xf32>
    %c4_i32 = arith.constant 4 : i32
    %149 = vector.broadcast %c4_i32 : i32 to vector<2x1xi32>
    %150 = arith.cmpi sgt, %0, %149 : vector<2x1xi32>
    %151 = vector.shape_cast %150 : vector<2x1xi1> to vector<2x1xi1>
    %152 = vector.broadcast %151 : vector<2x1xi1> to vector<2x32xi1>
    %153 = arith.select %152, %148, %123 : vector<2x32xi1>, vector<2x32xf32>
    %154 = vector.shape_cast %150 : vector<2x1xi1> to vector<2x1xi1>
    %155 = vector.broadcast %154 : vector<2x1xi1> to vector<2x32xi1>
    %156 = arith.select %155, %146, %126 : vector<2x32xi1>, vector<2x32xf32>
    %157 = vector.extract_strided_slice %4 {offsets = [0, 5], sizes = [2, 1], strides = [1, 1]} : vector<2x9xf32> to vector<2x1xf32>
    %158 = vector.broadcast %157 : vector<2x1xf32> to vector<2x128xf32>
    %159 = vector.broadcast %2 : vector<1x128xf32> to vector<2x128xf32>
    %160 = arith.mulf %158, %159 : vector<2x128xf32>
    %161 = vector.broadcast %3 : vector<1x128xf32> to vector<2x128xf32>
    %162 = arith.addf %160, %161 : vector<2x128xf32>
    %cst_23 = arith.constant dense<0.000000e+00> : vector<2x128xf32>
    %163 = tpu.matmul %153, %1, %cst_23 {dimension_numbers = #tpu.dot_dimension_numbers<[1], [0], [0], [1], [0, 0, 1, 1], [], []>} : vector<2x32xf32>, vector<32x128xf32>, vector<2x128xf32> -> vector<2x128xf32>
    %164 = arith.addf %162, %163 : vector<2x128xf32>
    %165 = math.tanh %164 : vector<2x128xf32>
    %cst_24 = arith.constant 5.000000e-01 : f32
    %166 = vector.broadcast %cst_24 : f32 to vector<2x128xf32>
    %167 = arith.mulf %166, %165 : vector<2x128xf32>
    %cst_25 = arith.constant 5.000000e-01 : f32
    %168 = vector.broadcast %cst_25 : f32 to vector<2x128xf32>
    %169 = arith.addf %167, %168 : vector<2x128xf32>
    %170 = vector.extract_strided_slice %169 {offsets = [0, 0], sizes = [2, 32], strides = [1, 1]} : vector<2x128xf32> to vector<2x32xf32>
    %171 = vector.extract_strided_slice %169 {offsets = [0, 32], sizes = [2, 32], strides = [1, 1]} : vector<2x128xf32> to vector<2x32xf32>
    %172 = vector.extract_strided_slice %165 {offsets = [0, 64], sizes = [2, 32], strides = [1, 1]} : vector<2x128xf32> to vector<2x32xf32>
    %173 = vector.extract_strided_slice %169 {offsets = [0, 96], sizes = [2, 32], strides = [1, 1]} : vector<2x128xf32> to vector<2x32xf32>
    %174 = arith.mulf %171, %156 : vector<2x32xf32>
    %175 = arith.mulf %170, %172 : vector<2x32xf32>
    %176 = arith.addf %174, %175 : vector<2x32xf32>
    %177 = math.tanh %176 : vector<2x32xf32>
    %178 = arith.mulf %173, %177 : vector<2x32xf32>
    %c5_i32 = arith.constant 5 : i32
    %179 = vector.broadcast %c5_i32 : i32 to vector<2x1xi32>
    %180 = arith.cmpi sgt, %0, %179 : vector<2x1xi32>
    %181 = vector.shape_cast %180 : vector<2x1xi1> to vector<2x1xi1>
    %182 = vector.broadcast %181 : vector<2x1xi1> to vector<2x32xi1>
    %183 = arith.select %182, %178, %153 : vector<2x32xi1>, vector<2x32xf32>
    %184 = vector.shape_cast %180 : vector<2x1xi1> to vector<2x1xi1>
    %185 = vector.broadcast %184 : vector<2x1xi1> to vector<2x32xi1>
    %186 = arith.select %185, %176, %156 : vector<2x32xi1>, vector<2x32xf32>
    %187 = vector.extract_strided_slice %4 {offsets = [0, 6], sizes = [2, 1], strides = [1, 1]} : vector<2x9xf32> to vector<2x1xf32>
    %188 = vector.broadcast %187 : vector<2x1xf32> to vector<2x128xf32>
    %189 = vector.broadcast %2 : vector<1x128xf32> to vector<2x128xf32>
    %190 = arith.mulf %188, %189 : vector<2x128xf32>
    %191 = vector.broadcast %3 : vector<1x128xf32> to vector<2x128xf32>
    %192 = arith.addf %190, %191 : vector<2x128xf32>
    %cst_26 = arith.constant dense<0.000000e+00> : vector<2x128xf32>
    %193 = tpu.matmul %183, %1, %cst_26 {dimension_numbers = #tpu.dot_dimension_numbers<[1], [0], [0], [1], [0, 0, 1, 1], [], []>} : vector<2x32xf32>, vector<32x128xf32>, vector<2x128xf32> -> vector<2x128xf32>
    %194 = arith.addf %192, %193 : vector<2x128xf32>
    %195 = math.tanh %194 : vector<2x128xf32>
    %cst_27 = arith.constant 5.000000e-01 : f32
    %196 = vector.broadcast %cst_27 : f32 to vector<2x128xf32>
    %197 = arith.mulf %196, %195 : vector<2x128xf32>
    %cst_28 = arith.constant 5.000000e-01 : f32
    %198 = vector.broadcast %cst_28 : f32 to vector<2x128xf32>
    %199 = arith.addf %197, %198 : vector<2x128xf32>
    %200 = vector.extract_strided_slice %199 {offsets = [0, 0], sizes = [2, 32], strides = [1, 1]} : vector<2x128xf32> to vector<2x32xf32>
    %201 = vector.extract_strided_slice %199 {offsets = [0, 32], sizes = [2, 32], strides = [1, 1]} : vector<2x128xf32> to vector<2x32xf32>
    %202 = vector.extract_strided_slice %195 {offsets = [0, 64], sizes = [2, 32], strides = [1, 1]} : vector<2x128xf32> to vector<2x32xf32>
    %203 = vector.extract_strided_slice %199 {offsets = [0, 96], sizes = [2, 32], strides = [1, 1]} : vector<2x128xf32> to vector<2x32xf32>
    %204 = arith.mulf %201, %186 : vector<2x32xf32>
    %205 = arith.mulf %200, %202 : vector<2x32xf32>
    %206 = arith.addf %204, %205 : vector<2x32xf32>
    %207 = math.tanh %206 : vector<2x32xf32>
    %208 = arith.mulf %203, %207 : vector<2x32xf32>
    %c6_i32 = arith.constant 6 : i32
    %209 = vector.broadcast %c6_i32 : i32 to vector<2x1xi32>
    %210 = arith.cmpi sgt, %0, %209 : vector<2x1xi32>
    %211 = vector.shape_cast %210 : vector<2x1xi1> to vector<2x1xi1>
    %212 = vector.broadcast %211 : vector<2x1xi1> to vector<2x32xi1>
    %213 = arith.select %212, %208, %183 : vector<2x32xi1>, vector<2x32xf32>
    %214 = vector.shape_cast %210 : vector<2x1xi1> to vector<2x1xi1>
    %215 = vector.broadcast %214 : vector<2x1xi1> to vector<2x32xi1>
    %216 = arith.select %215, %206, %186 : vector<2x32xi1>, vector<2x32xf32>
    %217 = vector.extract_strided_slice %4 {offsets = [0, 7], sizes = [2, 1], strides = [1, 1]} : vector<2x9xf32> to vector<2x1xf32>
    %218 = vector.broadcast %217 : vector<2x1xf32> to vector<2x128xf32>
    %219 = vector.broadcast %2 : vector<1x128xf32> to vector<2x128xf32>
    %220 = arith.mulf %218, %219 : vector<2x128xf32>
    %221 = vector.broadcast %3 : vector<1x128xf32> to vector<2x128xf32>
    %222 = arith.addf %220, %221 : vector<2x128xf32>
    %cst_29 = arith.constant dense<0.000000e+00> : vector<2x128xf32>
    %223 = tpu.matmul %213, %1, %cst_29 {dimension_numbers = #tpu.dot_dimension_numbers<[1], [0], [0], [1], [0, 0, 1, 1], [], []>} : vector<2x32xf32>, vector<32x128xf32>, vector<2x128xf32> -> vector<2x128xf32>
    %224 = arith.addf %222, %223 : vector<2x128xf32>
    %225 = math.tanh %224 : vector<2x128xf32>
    %cst_30 = arith.constant 5.000000e-01 : f32
    %226 = vector.broadcast %cst_30 : f32 to vector<2x128xf32>
    %227 = arith.mulf %226, %225 : vector<2x128xf32>
    %cst_31 = arith.constant 5.000000e-01 : f32
    %228 = vector.broadcast %cst_31 : f32 to vector<2x128xf32>
    %229 = arith.addf %227, %228 : vector<2x128xf32>
    %230 = vector.extract_strided_slice %229 {offsets = [0, 0], sizes = [2, 32], strides = [1, 1]} : vector<2x128xf32> to vector<2x32xf32>
    %231 = vector.extract_strided_slice %229 {offsets = [0, 32], sizes = [2, 32], strides = [1, 1]} : vector<2x128xf32> to vector<2x32xf32>
    %232 = vector.extract_strided_slice %225 {offsets = [0, 64], sizes = [2, 32], strides = [1, 1]} : vector<2x128xf32> to vector<2x32xf32>
    %233 = vector.extract_strided_slice %229 {offsets = [0, 96], sizes = [2, 32], strides = [1, 1]} : vector<2x128xf32> to vector<2x32xf32>
    %234 = arith.mulf %231, %216 : vector<2x32xf32>
    %235 = arith.mulf %230, %232 : vector<2x32xf32>
    %236 = arith.addf %234, %235 : vector<2x32xf32>
    %237 = math.tanh %236 : vector<2x32xf32>
    %238 = arith.mulf %233, %237 : vector<2x32xf32>
    %c7_i32 = arith.constant 7 : i32
    %239 = vector.broadcast %c7_i32 : i32 to vector<2x1xi32>
    %240 = arith.cmpi sgt, %0, %239 : vector<2x1xi32>
    %241 = vector.shape_cast %240 : vector<2x1xi1> to vector<2x1xi1>
    %242 = vector.broadcast %241 : vector<2x1xi1> to vector<2x32xi1>
    %243 = arith.select %242, %238, %213 : vector<2x32xi1>, vector<2x32xf32>
    %244 = vector.shape_cast %240 : vector<2x1xi1> to vector<2x1xi1>
    %245 = vector.broadcast %244 : vector<2x1xi1> to vector<2x32xi1>
    %246 = arith.select %245, %236, %216 : vector<2x32xi1>, vector<2x32xf32>
    %247 = vector.extract_strided_slice %4 {offsets = [0, 8], sizes = [2, 1], strides = [1, 1]} : vector<2x9xf32> to vector<2x1xf32>
    %248 = vector.broadcast %247 : vector<2x1xf32> to vector<2x128xf32>
    %249 = vector.broadcast %2 : vector<1x128xf32> to vector<2x128xf32>
    %250 = arith.mulf %248, %249 : vector<2x128xf32>
    %251 = vector.broadcast %3 : vector<1x128xf32> to vector<2x128xf32>
    %252 = arith.addf %250, %251 : vector<2x128xf32>
    %cst_32 = arith.constant dense<0.000000e+00> : vector<2x128xf32>
    %253 = tpu.matmul %243, %1, %cst_32 {dimension_numbers = #tpu.dot_dimension_numbers<[1], [0], [0], [1], [0, 0, 1, 1], [], []>} : vector<2x32xf32>, vector<32x128xf32>, vector<2x128xf32> -> vector<2x128xf32>
    %254 = arith.addf %252, %253 : vector<2x128xf32>
    %255 = math.tanh %254 : vector<2x128xf32>
    %cst_33 = arith.constant 5.000000e-01 : f32
    %256 = vector.broadcast %cst_33 : f32 to vector<2x128xf32>
    %257 = arith.mulf %256, %255 : vector<2x128xf32>
    %cst_34 = arith.constant 5.000000e-01 : f32
    %258 = vector.broadcast %cst_34 : f32 to vector<2x128xf32>
    %259 = arith.addf %257, %258 : vector<2x128xf32>
    %260 = vector.extract_strided_slice %259 {offsets = [0, 0], sizes = [2, 32], strides = [1, 1]} : vector<2x128xf32> to vector<2x32xf32>
    %261 = vector.extract_strided_slice %259 {offsets = [0, 32], sizes = [2, 32], strides = [1, 1]} : vector<2x128xf32> to vector<2x32xf32>
    %262 = vector.extract_strided_slice %255 {offsets = [0, 64], sizes = [2, 32], strides = [1, 1]} : vector<2x128xf32> to vector<2x32xf32>
    %263 = vector.extract_strided_slice %259 {offsets = [0, 96], sizes = [2, 32], strides = [1, 1]} : vector<2x128xf32> to vector<2x32xf32>
    %264 = arith.mulf %261, %246 : vector<2x32xf32>
    %265 = arith.mulf %260, %262 : vector<2x32xf32>
    %266 = arith.addf %264, %265 : vector<2x32xf32>
    %267 = math.tanh %266 : vector<2x32xf32>
    %268 = arith.mulf %263, %267 : vector<2x32xf32>
    %c8_i32 = arith.constant 8 : i32
    %269 = vector.broadcast %c8_i32 : i32 to vector<2x1xi32>
    %270 = arith.cmpi sgt, %0, %269 : vector<2x1xi32>
    %271 = vector.shape_cast %270 : vector<2x1xi1> to vector<2x1xi1>
    %272 = vector.broadcast %271 : vector<2x1xi1> to vector<2x32xi1>
    %273 = arith.select %272, %268, %243 : vector<2x32xi1>, vector<2x32xf32>
    %c32 = arith.constant 32 : index
    %c0_35 = arith.constant 0 : index
    %274 = vector.load %arg2[%c32, %c0_35] : memref<325x128xf32, #tpu.memory_space<vmem>>, vector<32x128xf32>
    %c64 = arith.constant 64 : index
    %c0_36 = arith.constant 0 : index
    %275 = vector.load %arg2[%c64, %c0_36] : memref<325x128xf32, #tpu.memory_space<vmem>>, vector<128x128xf32>
    %c192 = arith.constant 192 : index
    %c0_37 = arith.constant 0 : index
    %276 = vector.load %arg2[%c192, %c0_37] : memref<325x128xf32, #tpu.memory_space<vmem>>, vector<128x128xf32>
    %c322 = arith.constant 322 : index
    %c0_38 = arith.constant 0 : index
    %277 = vector.load %arg2[%c322, %c0_38] : memref<325x128xf32, #tpu.memory_space<vmem>>, vector<1x128xf32>
    %c323 = arith.constant 323 : index
    %c0_39 = arith.constant 0 : index
    %278 = vector.load %arg2[%c323, %c0_39] : memref<325x128xf32, #tpu.memory_space<vmem>>, vector<1x128xf32>
    %c324 = arith.constant 324 : index
    %c0_40 = arith.constant 0 : index
    %279 = vector.load %arg2[%c324, %c0_40] : memref<325x128xf32, #tpu.memory_space<vmem>>, vector<1x128xf32>
    %cst_41 = arith.constant dense<0.000000e+00> : vector<2x128xf32>
    %280 = tpu.matmul %273, %274, %cst_41 {dimension_numbers = #tpu.dot_dimension_numbers<[1], [0], [0], [1], [0, 0, 1, 1], [], []>} : vector<2x32xf32>, vector<32x128xf32>, vector<2x128xf32> -> vector<2x128xf32>
    %281 = vector.broadcast %277 : vector<1x128xf32> to vector<2x128xf32>
    %282 = arith.addf %280, %281 : vector<2x128xf32>
    %cst_42 = arith.constant 0.000000e+00 : f32
    %283 = vector.broadcast %cst_42 : f32 to vector<2x128xf32>
    %284 = arith.maximumf %282, %283 : vector<2x128xf32>
    %cst_43 = arith.constant dense<0.000000e+00> : vector<2x128xf32>
    %285 = tpu.matmul %284, %275, %cst_43 {dimension_numbers = #tpu.dot_dimension_numbers<[1], [0], [0], [1], [0, 0, 1, 1], [], []>} : vector<2x128xf32>, vector<128x128xf32>, vector<2x128xf32> -> vector<2x128xf32>
    %286 = vector.broadcast %278 : vector<1x128xf32> to vector<2x128xf32>
    %287 = arith.addf %285, %286 : vector<2x128xf32>
    %cst_44 = arith.constant 0.000000e+00 : f32
    %288 = vector.broadcast %cst_44 : f32 to vector<2x128xf32>
    %289 = arith.maximumf %287, %288 : vector<2x128xf32>
    %cst_45 = arith.constant dense<0.000000e+00> : vector<2x128xf32>
    %290 = tpu.matmul %289, %276, %cst_45 {dimension_numbers = #tpu.dot_dimension_numbers<[1], [0], [0], [1], [0, 0, 1, 1], [], []>} : vector<2x128xf32>, vector<128x128xf32>, vector<2x128xf32> -> vector<2x128xf32>
    %291 = vector.broadcast %279 : vector<1x128xf32> to vector<2x128xf32>
    %292 = arith.addf %290, %291 : vector<2x128xf32>
    %c0_46 = arith.constant 0 : index
    %c0_47 = arith.constant 0 : index
    %293 = vector.load %arg3[%c0_46, %c0_47] : memref<2x128xf32, #tpu.memory_space<vmem>>, vector<2x128xf32>
    tpu.vector_store %arg3[%c0_46, %c0_47], %292 {strides = array<i32>} : memref<2x128xf32, #tpu.memory_space<vmem>>, vector<2x128xf32>,
    return
  }
}

</mosaic_0001>

<bundles_post_ra>
// kernel: tpu_custom_call.1
= control target key start
LH: loop header
LB: loop body
LE: loop exit
PB: predicated region body
PF: predicated region fallthrough
CT: control target
= control target key end

     0   :  { %8 = vsyncpa [#allocation3], 0  ;;  %s2099_s0 = inlined_call_operand.vmem [shape: f32[2,9], index: 0, kind: input, shape index: {}]   ;;  %s2100_s1 = inlined_call_operand.vmem [shape: s32[2,1], index: 1, kind: input, shape index: {}]   ;;  %s2101_s2 = inlined_call_operand.hbm [shape: f32[325,128], index: 2, kind: input, shape index: {}]   ;;  %s2102_s3 = inlined_call_operand.hbm [shape: f32[2,128], index: 3, kind: output, shape index: {}]  }
   0x1   :  { %9 = vsyncpa [#allocation4], 0  ;;  %s1824_s12 = smov [#allocation2]   ;;  %s1776_s16 = scalar_lea.hbm %s2101_s2, 5248 }
   0x2   :  { %s19_s13 = sshll.u32 %s1824_s12, 4  ;;  %p1777_p0 = scmp.ne.s32.totalorder %s2101_s2, %s1776_s16  ;;  %s20_s13 = int_to_ptr.vmem [resolvable:$true] %s19_s13 }
   0x3   :  { %p1780_p1 = scmp.lt.u32.totalorder %s1776_s16, %s2101_s2 }
   0x5   :  { %p1782_p2 = pnand %p1780_p1, %p1777_p0 }
   0x7   :  { %1785 = shalt.err (!%p1782_p2)
}
   0x8   :  { %s1786_s21 = scalar_lea.vmem %s20_s13, 5248  ;;  %p1791_p4 = scmp.lt.s32.totalorder %s20_s13, %s20_s13 }
   0x9   :  { %p1787_p3 = scmp.ne.s32.totalorder %s20_s13, %s1786_s21  ;;  %p1792_p5 = scmp.lt.s32.totalorder %s1786_s21, %s1786_s21 }
   0xb   :  { %p1793_p6 = por %p1792_p5, %p1791_p4 }
   0xd   :  { %p1794_p7 = pnand %p1793_p6, %p1787_p3 }
   0xf   :  { %1797 = shalt.err (!%p1794_p7)
}
  0x10   :  { %s1825_s22 = smov 128   ;;  %s1826_s23 = smov 8  }
  0x11   :  { %25 = dma.hbm_to_vmem [thread:$0]  %s2101_s2, 5248, %s20_s13, [#allocation3], %s1825_s22, %s1825_s22, %s1826_s23  }
  0x12   :  { %1820 = dma.done.wait [#allocation3], 5248  }
  0x13   :  { %1821 = vsyncadd [#allocation3], 4294962048  ;;  %v1827_v0 = vmov 0.0|0.0   ;;  %vm1828_vm0 = vmmov 0   ;;  %v1829_v1 = vmov 0.0   ;;  %v1830_v2 = vmov 0  }
  0x14   :  { %1596 = vmatprep.subr.bf16.mxu0 %v1827_v0  ;;  %1424 = vmatprep.mubr.msk.f32.mxu0 %vm1828_vm0, %v1829_v1  ;;  %v30_v3 = vld [vmem:[#allocation2] sm:$0xff]  ;;  %v31_v4 = vld [vmem:[#allocation2 + $0x8] sm:$0xff]  ;;  %v32_v5 = vld [vmem:[#allocation2 + $0x10] sm:$0xff]  ;;  %s1832_s29 = smov 32   ;;  %v1833_v29 = vmov 1   ;;  %vm52_vm3 = vcmask 261120  }
  0x15   :  { %1722 = vset.pattern.permute.xlu0 %v1830_v2  ;;  %1723 = vset.pattern.permute.xlu1 %v1830_v2  ;;  %v1882_v6 = vpack.c.bf16 %v31_v4, %v30_v3  ;;  %v33_v7 = vld [vmem:[#allocation2 + $0x18] sm:$0xff]  ;;  %v1887_v8 = vld [vmem:[%s2099_s0] sm:$0x3]  ;;  %s1831_s0 = smov 64   ;;  %v1834_v52 = vmov 2  }
  0x16   :  { %1602 = vmatprep.subr.bf16.mxu1 %v1827_v0  ;;  %1435 = vmatprep.mubr.msk.f32.mxu1 %vm1828_vm0, %v1829_v1  ;;  %v1891_v9 = vpack.c.bf16 %v33_v7, %v32_v5  ;;  %v1907_v11 = vld [vmem:[#allocation2 + $0x140] ss:$0 sm:$0xff]  ;;  %v1910_v13 = vld [vmem:[#allocation2 + $0x141] ss:$0 sm:$0xff] }
  0x17   :  { %39 = vperm.xlu0 %1722, %v1887_v8   ;;  %1598 = vmatpush3.bf16.msra.mxu0 %v1882_v6  ;;  %v1917_v20 = vld [vmem:[%s2100_s1] sm:$0x3]  ;;  %s1841_s1 = smov [#allocation5]  }
  0x18   :  { %1604 = vmatpush3.bf16.msra.mxu1 %v1882_v6  ;;  %1599 = vmatprep.subr.bf16.mxu0 %v1827_v0  ;;  %vm147_vm1 = vcmp.gt.s32.totalorder %v1917_v20, 0  ;;  %vm257_vm4 = vcmp.gt.s32.totalorder %v1917_v20, 1  ;;  %vm367_vm6 = vcmp.gt.s32.totalorder %v1917_v20, 2  ;;  %vm477_vm8 = vcmp.gt.s32.totalorder %v1917_v20, 3  ;;  %s1309_s30 = sshll.u32 %s1841_s1, 4  ;;  %s1310_s30 = int_to_ptr.vmem [resolvable:$true] %s1309_s30 }
  0x19   :  { %1605 = vmatprep.subr.bf16.mxu1 %v1827_v0  ;;  %v148_v24 = vsel %vm147_vm1, 1, %v1830_v2  ;;  %v258_v35 = vsel %vm257_vm4, 1, %v1830_v2  ;;  %v368_v58 = vsel %vm367_vm6, 1, %v1830_v2  ;;  %vm587_vm10 = vcmp.gt.s32.totalorder %v1917_v20, 4  ;;  %s1798_s4 = scalar_lea.vmem %s1310_s30, 32  ;;  %p1803_p9 = scmp.lt.s32.totalorder %s1310_s30, %s1310_s30 }
  0x1a   :  { %vm697_vm12 = vcmp.gt.s32.totalorder %v1917_v20, 5  ;;  %vm807_vm14 = vcmp.gt.s32.totalorder %v1917_v20, 6  ;;  %vm917_vm1 = vcmp.gt.s32.totalorder %v1917_v20, 7  ;;  %vm1027_vm4 = vcmp.gt.s32.totalorder %v1917_v20, 8  ;;  %v1037_v20 = vld [vmem:[#allocation2 + $0x38] sm:$0xff]  ;;  %p1799_p8 = scmp.ne.s32.totalorder %s1310_s30, %s1798_s4  ;;  %p1804_p10 = scmp.lt.s32.totalorder %s1798_s4, %s1798_s4 }
  0x1b   :  { %1601 = vmatpush3.bf16.msra.mxu0 %v1891_v9  ;;  %1724 = vset.pattern.permute.xlu0 %v1833_v29 }
  0x1c   :  { %1607 = vmatpush3.bf16.msra.mxu1 %v1891_v9  ;;  %1608 = vmatprep.subr.bf16.mxu0 %v1827_v0  ;;  %p1805_p11 = por %p1804_p10, %p1803_p9 }
  0x1d   :  { %1614 = vmatprep.subr.bf16.mxu1 %v1827_v0 }
  0x1e   :  { %1425 = vmatmul.mubr.f32.vlgmr.msra.gmra.mrb[0].mxu0 %v1829_v1  ;;  %p1806_p12 = pnand %p1805_p11, %p1799_p8 }
  0x1f   :  { %1610 = vmatpush3.bf16.msra.mxu0 %v1882_v6  ;;  %1446 = vmatprep.mubr.msk.f32.mxu0 %vm1828_vm0, %v1829_v1 }
  0x20   :  { %1611 = vmatprep.subr.bf16.mxu0 %v1827_v0 }
  0x23   :  { %1613 = vmatpush3.bf16.msra.mxu0 %v1891_v9 }
  0x24   :  { %1620 = vmatprep.subr.bf16.mxu0 %v1827_v0 }
  0x96   :  { %v40_v10 = vpop.permute.xlu0 %39 }
  0x97   :  { %v46_v12 = vmul.f32 %v1907_v11, %v40_v10 }
  0x99   :  { %v51_v14 = vadd.f32 %v1910_v13, %v46_v12 }
  0xf1   :  { %v122_v15 = vpop.f32.mrb[0].mxu0 }
  0xf2   :  { %v126_v16 = vadd.f32 %v122_v15, %v51_v14  ;;  %v1426_v17 = vpop.f32.mrb[1].mxu0 }
  0xf4   :  { %1740 = vtanh.f32 %v126_v16 }
  0xfe   :  { %v1741_v18 = vpop.eup %1740 }
  0xff   :  { %132 = vrot.lane.b32.xlu0 %v1741_v18, %s1831_s0  ;;  %v128_v19 = vmul.f32 0.5, %v1741_v18 }
 0x101   :  { %v129_v21 = vadd.f32 0.5, %v128_v19  ;;  %v1835_v19 = vmov 3  }
 0x103   :  { %v130_v25 = vmul.f32 0.0, %v129_v21 }
 0x171   :  { %v133_v22 = vpop.permute.xlu0 %132 }
 0x172   :  { %v135_v23 = vmul.f32 %v133_v22, %v129_v21 }
 0x174   :  { %137 = vrot.lane.b32.xlu1 %v135_v23, %s1832_s29 }
 0x178   :  { %150 = vperm.xlu1 %1723, %v148_v24  }
 0x1e6   :  { %v138_v26 = vpop.permute.xlu1 %137 }
 0x1e7   :  { %v140_v27 = vadd.f32 %v138_v26, %v130_v25  ;;  %v478_v26 = vsel %vm477_vm8, 1, %v1830_v2 }
 0x1e9   :  { %1742 = vtanh.f32 %v140_v27 }
 0x1f3   :  { %v1743_v28 = vpop.eup %1742 }
 0x1f4   :  { %143 = vrot.lane.b32.xlu0 %v1743_v28, %s1831_s0 }
 0x1f7   :  { %v151_v30 = vpop.permute.xlu1 %150 }
 0x1f8   :  { %156 = vperm.xlu0 %1724, %v1887_v8   ;;  %vm152_vm2 = vcmp.eq.s32.totalorder %v151_v30, 1 }
 0x1f9   :  { %v154_v47 = vsel %vm152_vm2, %v140_v27, 0.0 }
 0x1fc   :  { %1725 = vset.pattern.permute.xlu0 %v1830_v2 }
 0x1fd   :  { %260 = vperm.xlu0 %1725, %v258_v35  }
 0x201   :  { %1726 = vset.pattern.permute.xlu0 %v1834_v52 }
 0x202   :  { %266 = vperm.xlu0 %1726, %v1887_v8  }
 0x206   :  { %1727 = vset.pattern.permute.xlu0 %v1830_v2 }
 0x207   :  { %370 = vperm.xlu0 %1727, %v368_v58  }
 0x20b   :  { %1728 = vset.pattern.permute.xlu0 %v1835_v19 }
 0x20c   :  { %376 = vperm.xlu0 %1728, %v1887_v8  }
 0x210   :  { %1729 = vset.pattern.permute.xlu0 %v1830_v2 }
 0x211   :  { %480 = vperm.xlu0 %1729, %v478_v26  }
 0x266   :  { %v144_v31 = vpop.permute.xlu0 %143 }
 0x267   :  { %v146_v32 = vmul.f32 %v144_v31, %v129_v21 }
 0x269   :  { %v153_v33 = vsel %vm152_vm2, %v146_v32, 0.0 }
 0x26a   :  { %162 = vrot.lane.b32.xlu1 %v153_v33, %s1832_s29 }
 0x277   :  { %v157_v36 = vpop.permute.xlu0 %156 }
 0x278   :  { %v159_v37 = vmul.f32 %v1907_v11, %v157_v36 }
 0x27a   :  { %v160_v38 = vadd.f32 %v1910_v13, %v159_v37 }
 0x27c   :  { %v261_v53 = vpop.permute.xlu0 %260 }
 0x27d   :  { %vm262_vm5 = vcmp.eq.s32.totalorder %v261_v53, 1 }
 0x281   :  { %v267_v59 = vpop.permute.xlu0 %266 }
 0x282   :  { %v269_v60 = vmul.f32 %v1907_v11, %v267_v59 }
 0x284   :  { %v270_v61 = vadd.f32 %v1910_v13, %v269_v60 }
 0x286   :  { %v371_v21 = vpop.permute.xlu0 %370 }
 0x287   :  { %vm372_vm7 = vcmp.eq.s32.totalorder %v371_v21, 1 }
 0x28b   :  { %v377_v27 = vpop.permute.xlu0 %376 }
 0x28c   :  { %v379_v28 = vmul.f32 %v1907_v11, %v377_v27 }
 0x28e   :  { %v380_v29 = vadd.f32 %v1910_v13, %v379_v28 }
 0x2dc   :  { %v163_v34 = vpop.permute.xlu1 %162 }
 0x2dd   :  { %1436 = vmatmul.mubr.msk.f32.vlgmr.msra.gmra.mrb[0].mxu1 %vm52_vm3, %v163_v34 }
 0x2de   :  { %1616 = vmatpush3.bf16.msra.mxu1 %v1882_v6  ;;  %1457 = vmatprep.mubr.msk.f32.mxu1 %vm1828_vm0, %v1829_v1 }
 0x2df   :  { %1617 = vmatprep.subr.bf16.mxu1 %v1827_v0 }
 0x2e2   :  { %1619 = vmatpush3.bf16.msra.mxu1 %v1891_v9 }
 0x2e3   :  { %1626 = vmatprep.subr.bf16.mxu1 %v1827_v0 }
 0x3b0   :  { %v232_v39 = vpop.f32.mrb[0].mxu1 }
 0x3b1   :  { %v236_v40 = vadd.f32 %v232_v39, %v160_v38  ;;  %v1437_v41 = vpop.f32.mrb[1].mxu1 }
 0x3b3   :  { %1744 = vtanh.f32 %v236_v40 }
 0x3bd   :  { %v1745_v42 = vpop.eup %1744 }
 0x3be   :  { %242 = vrot.lane.b32.xlu1 %v1745_v42, %s1831_s0  ;;  %v238_v43 = vmul.f32 0.5, %v1745_v42 }
 0x3c0   :  { %v239_v44 = vadd.f32 0.5, %v238_v43  ;;  %v1836_v43 = vmov 4  }
 0x3c1   :  { %1730 = vset.pattern.permute.xlu0 %v1836_v43 }
 0x3c2   :  { %v240_v48 = vmul.f32 %v239_v44, %v154_v47  ;;  %486 = vperm.xlu0 %1730, %v1887_v8  }
 0x3c6   :  { %1731 = vset.pattern.permute.xlu0 %v1830_v2 }
 0x430   :  { %v243_v45 = vpop.permute.xlu1 %242 }
 0x431   :  { %v245_v46 = vmul.f32 %v243_v45, %v239_v44 }
 0x433   :  { %247 = vrot.lane.b32.xlu1 %v245_v46, %s1832_s29 }
 0x4a5   :  { %v248_v49 = vpop.permute.xlu1 %247 }
 0x4a6   :  { %v250_v50 = vadd.f32 %v248_v49, %v240_v48  ;;  %v588_v49 = vsel %vm587_vm10, 1, %v1830_v2 }
 0x4a7   :  { %590 = vperm.xlu0 %1731, %v588_v49  }
 0x4a8   :  { %1746 = vtanh.f32 %v250_v50  ;;  %v264_v14 = vsel %vm262_vm5, %v250_v50, %v154_v47 }
 0x4b2   :  { %v1747_v51 = vpop.eup %1746 }
 0x4b3   :  { %253 = vrot.lane.b32.xlu1 %v1747_v51, %s1831_s0 }
 0x525   :  { %v254_v54 = vpop.permute.xlu1 %253 }
 0x526   :  { %v256_v55 = vmul.f32 %v254_v54, %v239_v44  ;;  %v481_v44 = vpop.permute.xlu0 %480 }
 0x527   :  { %vm482_vm9 = vcmp.eq.s32.totalorder %v481_v44, 1 }
 0x528   :  { %v263_v56 = vsel %vm262_vm5, %v256_v55, %v153_v33 }
 0x529   :  { %272 = vrot.lane.b32.xlu1 %v263_v56, %s1832_s29 }
 0x52a   :  { %v487_v50 = vpop.permute.xlu0 %486 }
 0x52b   :  { %v489_v51 = vmul.f32 %v1907_v11, %v487_v50 }
 0x52d   :  { %v490_v52 = vadd.f32 %v1910_v13, %v489_v51 }
 0x59b   :  { %v273_v57 = vpop.permute.xlu1 %272 }
 0x59c   :  { %1447 = vmatmul.mubr.msk.f32.vlgmr.msra.gmra.mrb[2].mxu0 %vm52_vm3, %v273_v57 }
 0x59d   :  { %1622 = vmatpush3.bf16.msra.mxu0 %v1882_v6  ;;  %1468 = vmatprep.mubr.msk.f32.mxu0 %vm1828_vm0, %v1829_v1 }
 0x59e   :  { %1623 = vmatprep.subr.bf16.mxu0 %v1827_v0 }
 0x5a1   :  { %1625 = vmatpush3.bf16.msra.mxu0 %v1891_v9 }
 0x5a2   :  { %1632 = vmatprep.subr.bf16.mxu0 %v1827_v0 }
 0x66f   :  { %v342_v62 = vpop.f32.mrb[2].mxu0 }
 0x670   :  { %v346_v63 = vadd.f32 %v342_v62, %v270_v61  ;;  %v1448_v3 = vpop.f32.mrb[3].mxu0 }
 0x672   :  { %1748 = vtanh.f32 %v346_v63 }
 0x67c   :  { %v1749_v4 = vpop.eup %1748 }
 0x67d   :  { %352 = vrot.lane.b32.xlu1 %v1749_v4, %s1831_s0  ;;  %v348_v5 = vmul.f32 0.5, %v1749_v4 }
 0x67f   :  { %v349_v7 = vadd.f32 0.5, %v348_v5  ;;  %v1837_v5 = vmov 5  }
 0x680   :  { %1732 = vset.pattern.permute.xlu0 %v1837_v5 }
 0x681   :  { %v350_v15 = vmul.f32 %v349_v7, %v264_v14  ;;  %596 = vperm.xlu0 %1732, %v1887_v8  }
 0x685   :  { %1733 = vset.pattern.permute.xlu0 %v1830_v2 }
 0x6ef   :  { %v353_v10 = vpop.permute.xlu1 %352 }
 0x6f0   :  { %v355_v12 = vmul.f32 %v353_v10, %v349_v7 }
 0x6f2   :  { %357 = vrot.lane.b32.xlu1 %v355_v12, %s1832_s29 }
 0x764   :  { %v358_v16 = vpop.permute.xlu1 %357 }
 0x765   :  { %v360_v17 = vadd.f32 %v358_v16, %v350_v15  ;;  %v698_v16 = vsel %vm697_vm12, 1, %v1830_v2 }
 0x766   :  { %700 = vperm.xlu0 %1733, %v698_v16  }
 0x767   :  { %1750 = vtanh.f32 %v360_v17  ;;  %v374_v38 = vsel %vm372_vm7, %v360_v17, %v264_v14 }
 0x771   :  { %v1751_v18 = vpop.eup %1750 }
 0x772   :  { %363 = vrot.lane.b32.xlu1 %v1751_v18, %s1831_s0 }
 0x7e4   :  { %v364_v22 = vpop.permute.xlu1 %363 }
 0x7e5   :  { %v366_v23 = vmul.f32 %v364_v22, %v349_v7  ;;  %v591_v7 = vpop.permute.xlu0 %590 }
 0x7e6   :  { %vm592_vm11 = vcmp.eq.s32.totalorder %v591_v7, 1 }
 0x7e7   :  { %v373_v24 = vsel %vm372_vm7, %v366_v23, %v263_v56 }
 0x7e8   :  { %382 = vrot.lane.b32.xlu1 %v373_v24, %s1832_s29 }
 0x7e9   :  { %v597_v17 = vpop.permute.xlu0 %596 }
 0x7ea   :  { %v599_v18 = vmul.f32 %v1907_v11, %v597_v17 }
 0x7ec   :  { %v600_v19 = vadd.f32 %v1910_v13, %v599_v18 }
 0x85a   :  { %v383_v25 = vpop.permute.xlu1 %382 }
 0x85b   :  { %1458 = vmatmul.mubr.msk.f32.vlgmr.msra.gmra.mrb[2].mxu1 %vm52_vm3, %v383_v25 }
 0x85c   :  { %1628 = vmatpush3.bf16.msra.mxu1 %v1882_v6  ;;  %1479 = vmatprep.mubr.msk.f32.mxu1 %vm1828_vm0, %v1829_v1 }
 0x85d   :  { %1629 = vmatprep.subr.bf16.mxu1 %v1827_v0 }
 0x860   :  { %1631 = vmatpush3.bf16.msra.mxu1 %v1891_v9 }
 0x861   :  { %1638 = vmatprep.subr.bf16.mxu1 %v1827_v0 }
 0x92e   :  { %v452_v30 = vpop.f32.mrb[2].mxu1 }
 0x92f   :  { %v456_v31 = vadd.f32 %v452_v30, %v380_v29  ;;  %v1459_v32 = vpop.f32.mrb[3].mxu1 }
 0x931   :  { %1752 = vtanh.f32 %v456_v31 }
 0x93b   :  { %v1753_v33 = vpop.eup %1752 }
 0x93c   :  { %462 = vrot.lane.b32.xlu1 %v1753_v33, %s1831_s0  ;;  %v458_v34 = vmul.f32 0.5, %v1753_v33 }
 0x93e   :  { %v459_v35 = vadd.f32 0.5, %v458_v34  ;;  %v1838_v34 = vmov 6  }
 0x93f   :  { %1734 = vset.pattern.permute.xlu0 %v1838_v34 }
 0x940   :  { %v460_v39 = vmul.f32 %v459_v35, %v374_v38  ;;  %706 = vperm.xlu0 %1734, %v1887_v8  }
 0x944   :  { %1735 = vset.pattern.permute.xlu0 %v1830_v2 }
 0x9ae   :  { %v463_v36 = vpop.permute.xlu1 %462 }
 0x9af   :  { %v465_v37 = vmul.f32 %v463_v36, %v459_v35 }
 0x9b1   :  { %467 = vrot.lane.b32.xlu1 %v465_v37, %s1832_s29 }
 0xa23   :  { %v468_v40 = vpop.permute.xlu1 %467 }
 0xa24   :  { %v470_v41 = vadd.f32 %v468_v40, %v460_v39  ;;  %v808_v40 = vsel %vm807_vm14, 1, %v1830_v2 }
 0xa25   :  { %810 = vperm.xlu0 %1735, %v808_v40  }
 0xa26   :  { %1754 = vtanh.f32 %v470_v41  ;;  %v484_v61 = vsel %vm482_vm9, %v470_v41, %v374_v38 }
 0xa30   :  { %v1755_v42 = vpop.eup %1754 }
 0xa31   :  { %473 = vrot.lane.b32.xlu1 %v1755_v42, %s1831_s0 }
 0xaa3   :  { %v474_v45 = vpop.permute.xlu1 %473 }
 0xaa4   :  { %v476_v46 = vmul.f32 %v474_v45, %v459_v35  ;;  %v701_v35 = vpop.permute.xlu0 %700 }
 0xaa5   :  { %vm702_vm13 = vcmp.eq.s32.totalorder %v701_v35, 1  ;;  %v1028_v35 = vsel %vm1027_vm4, 1, %v1830_v2 }
 0xaa6   :  { %v483_v47 = vsel %vm482_vm9, %v476_v46, %v373_v24 }
 0xaa7   :  { %492 = vrot.lane.b32.xlu1 %v483_v47, %s1832_s29 }
 0xaa8   :  { %v707_v41 = vpop.permute.xlu0 %706 }
 0xaa9   :  { %v709_v42 = vmul.f32 %v1907_v11, %v707_v41 }
 0xaab   :  { %v710_v43 = vadd.f32 %v1910_v13, %v709_v42  ;;  %v1034_v42 = vld [vmem:[#allocation2 + $0x20] sm:$0xff] }
 0xb19   :  { %v493_v48 = vpop.permute.xlu1 %492 }
 0xb1a   :  { %1469 = vmatmul.mubr.msk.f32.vlgmr.msra.gmra.mrb[4].mxu0 %vm52_vm3, %v493_v48 }
 0xb1b   :  { %1634 = vmatpush3.bf16.msra.mxu0 %v1882_v6  ;;  %1490 = vmatprep.mubr.msk.f32.mxu0 %vm1828_vm0, %v1829_v1 }
 0xb1c   :  { %1635 = vmatprep.subr.bf16.mxu0 %v1827_v0 }
 0xb1f   :  { %1637 = vmatpush3.bf16.msra.mxu0 %v1891_v9 }
 0xb20   :  { %1644 = vmatprep.subr.bf16.mxu0 %v1827_v0 }
 0xbed   :  { %v562_v53 = vpop.f32.mrb[4].mxu0 }
 0xbee   :  { %v566_v54 = vadd.f32 %v562_v53, %v490_v52  ;;  %v1470_v55 = vpop.f32.mrb[5].mxu0 }
 0xbef   :  { %v1839_v55 = vmov 7  }
 0xbf0   :  { %1756 = vtanh.f32 %v566_v54  ;;  %1736 = vset.pattern.permute.xlu0 %v1839_v55  ;;  %v1044_v55 = vld [vmem:[#allocation2 + $0x70] sm:$0xff] }
 0xbf1   :  { %816 = vperm.xlu0 %1736, %v1887_v8  }
 0xbf5   :  { %1737 = vset.pattern.permute.xlu0 %v1830_v2 }
 0xbfa   :  { %v1757_v56 = vpop.eup %1756 }
 0xbfb   :  { %572 = vrot.lane.b32.xlu1 %v1757_v56, %s1831_s0  ;;  %v568_v57 = vmul.f32 0.5, %v1757_v56  ;;  %v811_v56 = vpop.permute.xlu0 %810 }
 0xbfc   :  { %vm812_vm15 = vcmp.eq.s32.totalorder %v811_v56, 1  ;;  %v1045_v56 = vld [vmem:[#allocation2 + $0x78] sm:$0xff] }
 0xbfd   :  { %v569_v58 = vadd.f32 0.5, %v568_v57 }
 0xbff   :  { %v570_v62 = vmul.f32 %v569_v58, %v484_v61 }
 0xc6d   :  { %v573_v59 = vpop.permute.xlu1 %572 }
 0xc6e   :  { %v575_v60 = vmul.f32 %v573_v59, %v569_v58 }
 0xc70   :  { %577 = vrot.lane.b32.xlu1 %v575_v60, %s1832_s29 }
 0xce2   :  { %v578_v63 = vpop.permute.xlu1 %577 }
 0xce3   :  { %v580_v3 = vadd.f32 %v578_v63, %v570_v62  ;;  %v817_v62 = vpop.permute.xlu0 %816 }
 0xce4   :  { %v819_v63 = vmul.f32 %v1907_v11, %v817_v62  ;;  %v1047_v62 = vld [vmem:[#allocation2 + $0x88] sm:$0xff] }
 0xce5   :  { %1758 = vtanh.f32 %v580_v3  ;;  %v594_v29 = vsel %vm592_vm11, %v580_v3, %v484_v61  ;;  %v918_v61 = vsel %vm917_vm1, 1, %v1830_v2 }
 0xce6   :  { %920 = vperm.xlu0 %1737, %v918_v61   ;;  %v820_v3 = vadd.f32 %v1910_v13, %v819_v63  ;;  %v1046_v61 = vld [vmem:[#allocation2 + $0x80] sm:$0xff] }
 0xce7   :  { %v1669_v63 = vpack.c.bf16 %v1047_v62, %v1046_v61 }
 0xcef   :  { %v1759_v4 = vpop.eup %1758 }
 0xcf0   :  { %583 = vrot.lane.b32.xlu1 %v1759_v4, %s1831_s0 }
 0xd62   :  { %v584_v10 = vpop.permute.xlu1 %583 }
 0xd63   :  { %v586_v12 = vmul.f32 %v584_v10, %v569_v58 }
 0xd65   :  { %v593_v14 = vsel %vm592_vm11, %v586_v12, %v483_v47 }
 0xd66   :  { %602 = vrot.lane.b32.xlu1 %v593_v14, %s1832_s29 }
 0xdd8   :  { %v603_v15 = vpop.permute.xlu1 %602 }
 0xdd9   :  { %1480 = vmatmul.mubr.msk.f32.vlgmr.msra.gmra.mrb[4].mxu1 %vm52_vm3, %v603_v15 }
 0xdda   :  { %1640 = vmatpush3.bf16.msra.mxu1 %v1882_v6  ;;  %1501 = vmatprep.mubr.msk.f32.mxu1 %vm1828_vm0, %v1829_v1 }
 0xddb   :  { %1641 = vmatprep.subr.bf16.mxu1 %v1827_v0 }
 0xdde   :  { %1643 = vmatpush3.bf16.msra.mxu1 %v1891_v9 }
 0xddf   :  { %1650 = vmatprep.subr.bf16.mxu1 %v1827_v0 }
 0xeac   :  { %v672_v21 = vpop.f32.mrb[4].mxu1 }
 0xead   :  { %v676_v22 = vadd.f32 %v672_v21, %v600_v19  ;;  %v1481_v23 = vpop.f32.mrb[5].mxu1 }
 0xeae   :  { %v1840_v23 = vmov 8  }
 0xeaf   :  { %1760 = vtanh.f32 %v676_v22  ;;  %1738 = vset.pattern.permute.xlu0 %v1840_v23  ;;  %v1057_v23 = vld [vmem:[#allocation2 + $0xd8] sm:$0xff] }
 0xeb0   :  { %926 = vperm.xlu0 %1738, %v1887_v8  }
 0xeb4   :  { %1739 = vset.pattern.permute.xlu0 %v1830_v2 }
 0xeb5   :  { %1030 = vperm.xlu0 %1739, %v1028_v35   ;;  %v1066_v35 = vld [vmem:[#allocation2 + $0x120] sm:$0xff] }
 0xeb9   :  { %v1761_v24 = vpop.eup %1760 }
 0xeba   :  { %682 = vrot.lane.b32.xlu1 %v1761_v24, %s1831_s0  ;;  %v678_v25 = vmul.f32 0.5, %v1761_v24  ;;  %v921_v24 = vpop.permute.xlu0 %920 }
 0xebb   :  { %vm922_vm2 = vcmp.eq.s32.totalorder %v921_v24, 1 }
 0xebc   :  { %v679_v26 = vadd.f32 0.5, %v678_v25 }
 0xebe   :  { %v680_v30 = vmul.f32 %v679_v26, %v594_v29 }
 0xf2c   :  { %v683_v27 = vpop.permute.xlu1 %682 }
 0xf2d   :  { %v685_v28 = vmul.f32 %v683_v27, %v679_v26 }
 0xf2f   :  { %687 = vrot.lane.b32.xlu1 %v685_v28, %s1832_s29 }
 0xfa1   :  { %v688_v31 = vpop.permute.xlu1 %687 }
 0xfa2   :  { %v690_v32 = vadd.f32 %v688_v31, %v680_v30 }
 0xfa4   :  { %1762 = vtanh.f32 %v690_v32  ;;  %v704_v50 = vsel %vm702_vm13, %v690_v32, %v594_v29  ;;  %v927_v29 = vpop.permute.xlu0 %926 }
 0xfa5   :  { %v929_v30 = vmul.f32 %v1907_v11, %v927_v29 }
 0xfa7   :  { %v930_v8 = vadd.f32 %v1910_v13, %v929_v30  ;;  %v1062_v30 = vld [vmem:[#allocation2 + $0x100] sm:$0xff] }
 0xfae   :  { %v1763_v33 = vpop.eup %1762 }
 0xfaf   :  { %693 = vrot.lane.b32.xlu1 %v1763_v33, %s1831_s0 }
0x1021   :  { %v694_v36 = vpop.permute.xlu1 %693 }
0x1022   :  { %v696_v37 = vmul.f32 %v694_v36, %v679_v26 }
0x1024   :  { %v703_v38 = vsel %vm702_vm13, %v696_v37, %v593_v14 }
0x1025   :  { %712 = vrot.lane.b32.xlu1 %v703_v38, %s1832_s29 }
0x1097   :  { %v713_v39 = vpop.permute.xlu1 %712 }
0x1098   :  { %1491 = vmatmul.mubr.msk.f32.vlgmr.msra.gmra.mrb[6].mxu0 %vm52_vm3, %v713_v39 }
0x1099   :  { %1646 = vmatpush3.bf16.msra.mxu0 %v1882_v6  ;;  %1512 = vmatprep.mubr.msk.f32.mxu0 %vm1828_vm0, %v1829_v1 }
0x109a   :  { %1647 = vmatprep.subr.bf16.mxu0 %v1827_v0 }
0x109d   :  { %1649 = vmatpush3.bf16.msra.mxu0 %v1891_v9 }
0x109e   :  { %1656 = vmatprep.subr.bf16.mxu0 %v1827_v0 }
0x116b   :  { %v782_v6 = vpop.f32.mrb[6].mxu0 }
0x116c   :  { %v786_v44 = vadd.f32 %v782_v6, %v710_v43  ;;  %v1492_v45 = vpop.f32.mrb[7].mxu0  ;;  %v1035_v43 = vld [vmem:[#allocation2 + $0x28] sm:$0xff]  ;;  %v1036_v6 = vld [vmem:[#allocation2 + $0x30] sm:$0xff] }
0x116d   :  { %v1654_v2 = vpack.c.bf16 %v1037_v20, %v1036_v6  ;;  %v1330_v6 = vld [vmem:[#allocation2 + $0x143] ss:$0 sm:$0xff] }
0x116e   :  { %1764 = vtanh.f32 %v786_v44  ;;  %v1651_v44 = vpack.c.bf16 %v1035_v43, %v1034_v42  ;;  %v1069_v42 = vld [vmem:[#allocation2 + $0x138] sm:$0xff] }
0x1178   :  { %v1765_v46 = vpop.eup %1764 }
0x1179   :  { %792 = vrot.lane.b32.xlu1 %v1765_v46, %s1831_s0  ;;  %v788_v9 = vmul.f32 0.5, %v1765_v46  ;;  %v1038_v46 = vld [vmem:[#allocation2 + $0x40] sm:$0xff] }
0x117b   :  { %v789_v47 = vadd.f32 0.5, %v788_v9  ;;  %v1039_v9 = vld [vmem:[#allocation2 + $0x48] sm:$0xff] }
0x117d   :  { %v790_v51 = vmul.f32 %v789_v47, %v704_v50 }
0x11eb   :  { %v793_v48 = vpop.permute.xlu1 %792 }
0x11ec   :  { %v795_v49 = vmul.f32 %v793_v48, %v789_v47  ;;  %v1657_v48 = vpack.c.bf16 %v1039_v9, %v1038_v46  ;;  %v1331_v46 = vld [vmem:[#allocation2 + $0x144] ss:$0 sm:$0xff] }
0x11ee   :  { %797 = vrot.lane.b32.xlu1 %v795_v49, %s1832_s29  ;;  %v1041_v49 = vld [vmem:[#allocation2 + $0x58] sm:$0xff] }
0x1260   :  { %v798_v52 = vpop.permute.xlu1 %797 }
0x1261   :  { %v800_v53 = vadd.f32 %v798_v52, %v790_v51  ;;  %v1042_v51 = vld [vmem:[#allocation2 + $0x60] sm:$0xff]  ;;  %v1043_v52 = vld [vmem:[#allocation2 + $0x68] sm:$0xff] }
0x1263   :  { %1766 = vtanh.f32 %v800_v53  ;;  %v814_v17 = vsel %vm812_vm15, %v800_v53, %v704_v50  ;;  %v1031_v53 = vpop.permute.xlu0 %1030 }
0x1264   :  { %vm1032_vm5 = vcmp.eq.s32.totalorder %v1031_v53, 1 }
0x126d   :  { %v1767_v54 = vpop.eup %1766 }
0x126e   :  { %803 = vrot.lane.b32.xlu1 %v1767_v54, %s1831_s0  ;;  %v1663_v54 = vpack.c.bf16 %v1043_v52, %v1042_v51 }
0x12e0   :  { %v804_v57 = vpop.permute.xlu1 %803 }
0x12e1   :  { %v806_v58 = vmul.f32 %v804_v57, %v789_v47  ;;  %v1040_v47 = vld [vmem:[#allocation2 + $0x50] sm:$0xff] }
0x12e2   :  { %v1660_v50 = vpack.c.bf16 %v1041_v49, %v1040_v47 }
0x12e3   :  { %v813_v59 = vsel %vm812_vm15, %v806_v58, %v703_v38 }
0x12e4   :  { %822 = vrot.lane.b32.xlu1 %v813_v59, %s1832_s29 }
0x1356   :  { %v823_v60 = vpop.permute.xlu1 %822 }
0x1357   :  { %1502 = vmatmul.mubr.msk.f32.vlgmr.msra.gmra.mrb[6].mxu1 %vm52_vm3, %v823_v60 }
0x1358   :  { %1523 = vmatprep.mubr.msk.f32.mxu1 %vm1828_vm0, %v1829_v1  ;;  %1652 = vmatpush3.bf16.msra.mxu1 %v1651_v44 }
0x1359   :  { %1653 = vmatprep.subr.bf16.mxu1 %v1827_v0 }
0x135c   :  { %1655 = vmatpush3.bf16.msra.mxu1 %v1654_v2 }
0x135d   :  { %1680 = vmatprep.subr.bf16.mxu1 %v1827_v0 }
0x142a   :  { %v892_v4 = vpop.f32.mrb[6].mxu1 }
0x142b   :  { %v896_v5 = vadd.f32 %v892_v4, %v820_v3  ;;  %v1503_v7 = vpop.f32.mrb[7].mxu1  ;;  %v1048_v3 = vld [vmem:[#allocation2 + $0x90] sm:$0xff]  ;;  %v1049_v4 = vld [vmem:[#allocation2 + $0x98] sm:$0xff] }
0x142c   :  { %v1050_v7 = vld [vmem:[#allocation2 + $0xa0] sm:$0xff] }
0x142d   :  { %1768 = vtanh.f32 %v896_v5  ;;  %v1672_v5 = vpack.c.bf16 %v1049_v4, %v1048_v3 }
0x1437   :  { %v1769_v10 = vpop.eup %1768 }
0x1438   :  { %902 = vrot.lane.b32.xlu1 %v1769_v10, %s1831_s0  ;;  %v898_v12 = vmul.f32 0.5, %v1769_v10  ;;  %v1051_v10 = vld [vmem:[#allocation2 + $0xa8] sm:$0xff] }
0x143a   :  { %v899_v14 = vadd.f32 0.5, %v898_v12  ;;  %v1675_v12 = vpack.c.bf16 %v1051_v10, %v1050_v7 }
0x143c   :  { %v900_v18 = vmul.f32 %v899_v14, %v814_v17 }
0x14aa   :  { %v903_v15 = vpop.permute.xlu1 %902 }
0x14ab   :  { %v905_v16 = vmul.f32 %v903_v15, %v899_v14  ;;  %v1052_v15 = vld [vmem:[#allocation2 + $0xb0] sm:$0xff] }
0x14ad   :  { %907 = vrot.lane.b32.xlu1 %v905_v16, %s1832_s29  ;;  %v1053_v16 = vld [vmem:[#allocation2 + $0xb8] sm:$0xff] }
0x151f   :  { %v908_v19 = vpop.permute.xlu1 %907 }
0x1520   :  { %v910_v21 = vadd.f32 %v908_v19, %v900_v18  ;;  %v1054_v18 = vld [vmem:[#allocation2 + $0xc0] sm:$0xff]  ;;  %v1055_v19 = vld [vmem:[#allocation2 + $0xc8] sm:$0xff] }
0x1522   :  { %1770 = vtanh.f32 %v910_v21  ;;  %v924_v11 = vsel %vm922_vm2, %v910_v21, %v814_v17  ;;  %v1678_v17 = vpack.c.bf16 %v1053_v16, %v1052_v15  ;;  %v1056_v21 = vld [vmem:[#allocation2 + $0xd0] sm:$0xff] }
0x1523   :  { %v1684_v24 = vpack.c.bf16 %v1057_v23, %v1056_v21 }
0x152c   :  { %v1771_v22 = vpop.eup %1770 }
0x152d   :  { %913 = vrot.lane.b32.xlu1 %v1771_v22, %s1831_s0  ;;  %v1681_v22 = vpack.c.bf16 %v1055_v19, %v1054_v18 }
0x159f   :  { %v914_v25 = vpop.permute.xlu1 %913 }
0x15a0   :  { %v916_v26 = vmul.f32 %v914_v25, %v899_v14  ;;  %v1058_v25 = vld [vmem:[#allocation2 + $0xe0] sm:$0xff] }
0x15a2   :  { %v923_v27 = vsel %vm922_vm2, %v916_v26, %v813_v59  ;;  %v1666_v59 = vpack.c.bf16 %v1045_v56, %v1044_v55  ;;  %v1059_v26 = vld [vmem:[#allocation2 + $0xe8] sm:$0xff] }
0x15a3   :  { %932 = vrot.lane.b32.xlu1 %v923_v27, %s1832_s29 }
0x1615   :  { %v933_v28 = vpop.permute.xlu1 %932 }
0x1616   :  { %1513 = vmatmul.mubr.msk.f32.vlgmr.msra.gmra.mrb[8].mxu0 %vm52_vm3, %v933_v28  ;;  %v1061_v28 = vld [vmem:[#allocation2 + $0xf8] sm:$0xff] }
0x1617   :  { %1558 = vmatprep.mubr.msk.f32.mxu0 %vm1828_vm0, %v1829_v1  ;;  %1658 = vmatpush3.bf16.msra.mxu0 %v1657_v48 }
0x1618   :  { %1659 = vmatprep.subr.bf16.mxu0 %v1827_v0 }
0x161b   :  { %1661 = vmatpush3.bf16.msra.mxu0 %v1660_v50 }
0x161c   :  { %1662 = vmatprep.subr.bf16.mxu0 %v1827_v0 }
0x161f   :  { %1664 = vmatpush3.bf16.msra.mxu0 %v1663_v54 }
0x1620   :  { %1665 = vmatprep.subr.bf16.mxu0 %v1827_v0 }
0x1623   :  { %1667 = vmatpush3.bf16.msra.mxu0 %v1666_v59 }
0x1624   :  { %1668 = vmatprep.subr.bf16.mxu0 %v1827_v0 }
0x1627   :  { %1670 = vmatpush3.bf16.msra.mxu0 %v1669_v63 }
0x1628   :  { %1671 = vmatprep.subr.bf16.mxu0 %v1827_v0 }
0x162b   :  { %1673 = vmatpush3.bf16.msra.mxu0 %v1672_v5 }
0x162c   :  { %1674 = vmatprep.subr.bf16.mxu0 %v1827_v0 }
0x162f   :  { %1676 = vmatpush3.bf16.msra.mxu0 %v1675_v12 }
0x1630   :  { %1677 = vmatprep.subr.bf16.mxu0 %v1827_v0 }
0x1633   :  { %1679 = vmatpush3.bf16.msra.mxu0 %v1678_v17 }
0x16e9   :  { %v1002_v31 = vpop.f32.mrb[8].mxu0 }
0x16ea   :  { %v1006_v32 = vadd.f32 %v1002_v31, %v930_v8  ;;  %v1514_v33 = vpop.f32.mrb[9].mxu0  ;;  %v1063_v8 = vld [vmem:[#allocation2 + $0x108] sm:$0xff] }
0x16eb   :  { %v1693_v31 = vpack.c.bf16 %v1063_v8, %v1062_v30  ;;  %v1065_v33 = vld [vmem:[#allocation2 + $0x118] sm:$0xff] }
0x16ec   :  { %1772 = vtanh.f32 %v1006_v32  ;;  %v1064_v32 = vld [vmem:[#allocation2 + $0x110] sm:$0xff] }
0x16f6   :  { %v1773_v34 = vpop.eup %1772 }
0x16f7   :  { %1012 = vrot.lane.b32.xlu1 %v1773_v34, %s1831_s0  ;;  %v1008_v36 = vmul.f32 0.5, %v1773_v34  ;;  %v1696_v34 = vpack.c.bf16 %v1065_v33, %v1064_v32 }
0x16f9   :  { %v1009_v37 = vadd.f32 0.5, %v1008_v36  ;;  %v1067_v36 = vld [vmem:[#allocation2 + $0x128] sm:$0xff] }
0x16fb   :  { %v1010_v13 = vmul.f32 %v1009_v37, %v924_v11 }
0x1769   :  { %v1013_v38 = vpop.permute.xlu1 %1012 }
0x176a   :  { %v1015_v39 = vmul.f32 %v1013_v38, %v1009_v37  ;;  %v1328_v38 = vld [vmem:[#allocation2 + $0x142] ss:$0 sm:$0xff] }
0x176c   :  { %1017 = vrot.lane.b32.xlu1 %v1015_v39, %s1832_s29 }
0x17de   :  { %v1018_v40 = vpop.permute.xlu1 %1017 }
0x17df   :  { %v1020_v41 = vadd.f32 %v1018_v40, %v1010_v13 }
0x17e1   :  { %1774 = vtanh.f32 %v1020_v41  ;;  %v1068_v41 = vld [vmem:[#allocation2 + $0x130] sm:$0xff] }
0x17e2   :  { %v1702_v43 = vpack.c.bf16 %v1069_v42, %v1068_v41 }
0x17eb   :  { %v1775_v45 = vpop.eup %1774 }
0x17ec   :  { %1023 = vrot.lane.b32.xlu1 %v1775_v45, %s1831_s0 }
0x185e   :  { %v1024_v57 = vpop.permute.xlu1 %1023 }
0x185f   :  { %v1026_v58 = vmul.f32 %v1024_v57, %v1009_v37  ;;  %v1699_v37 = vpack.c.bf16 %v1067_v36, %v1066_v35 }
0x1861   :  { %v1033_v60 = vsel %vm1032_vm5, %v1026_v58, %v923_v27  ;;  %v1687_v27 = vpack.c.bf16 %v1059_v26, %v1058_v25 }
0x1862   :  { %1078 = vrot.lane.b32.xlu1 %v1033_v60, %s1832_s29 }
0x18d4   :  { %v1079_v14 = vpop.permute.xlu1 %1078 }
0x18d5   :  { %1524 = vmatmul.mubr.msk.f32.vlgmr.msra.gmra.mrb[8].mxu1 %vm52_vm3, %v1079_v14 }
0x18d6   :  { %1593 = vmatprep.mubr.msk.f32.mxu1 %vm1828_vm0, %v1829_v1  ;;  %1682 = vmatpush3.bf16.msra.mxu1 %v1681_v22  ;;  %v1060_v1 = vld [vmem:[#allocation2 + $0xf0] sm:$0xff] }
0x18d7   :  { %1683 = vmatprep.subr.bf16.mxu1 %v1827_v0  ;;  %v1690_v29 = vpack.c.bf16 %v1061_v28, %v1060_v1 }
0x18da   :  { %1685 = vmatpush3.bf16.msra.mxu1 %v1684_v24 }
0x18db   :  { %1686 = vmatprep.subr.bf16.mxu1 %v1827_v0 }
0x18de   :  { %1688 = vmatpush3.bf16.msra.mxu1 %v1687_v27 }
0x18df   :  { %1689 = vmatprep.subr.bf16.mxu1 %v1827_v0 }
0x18e2   :  { %1691 = vmatpush3.bf16.msra.mxu1 %v1690_v29 }
0x18e3   :  { %1692 = vmatprep.subr.bf16.mxu1 %v1827_v0 }
0x18e6   :  { %1694 = vmatpush3.bf16.msra.mxu1 %v1693_v31 }
0x18e7   :  { %1695 = vmatprep.subr.bf16.mxu1 %v1827_v0 }
0x18ea   :  { %1697 = vmatpush3.bf16.msra.mxu1 %v1696_v34 }
0x18eb   :  { %1698 = vmatprep.subr.bf16.mxu1 %v1827_v0 }
0x18ee   :  { %1700 = vmatpush3.bf16.msra.mxu1 %v1699_v37 }
0x18ef   :  { %1701 = vmatprep.subr.bf16.mxu1 %v1827_v0 }
0x18f2   :  { %1703 = vmatpush3.bf16.msra.mxu1 %v1702_v43 }
0x19a8   :  { %v1148_v39 = vpop.f32.mrb[8].mxu1 }
0x19a9   :  { %v1149_v11 = vadd.f32 %v1328_v38, %v1148_v39  ;;  %v1525_v13 = vpop.f32.mrb[9].mxu1 }
0x19ab   :  { %v1152_v40 = vmax.f32 %v1149_v11, 0.0 }
0x19ad   :  { %1559 = vmatmul.mubr.f32.vlgmr.msra.gmra.mrb[10].mxu0 %v1152_v40 }
0x1a80   :  { %v1223_v44 = vpop.f32.mrb[10].mxu0 }
0x1a81   :  { %v1224_v20 = vadd.f32 %v1330_v6, %v1223_v44  ;;  %v1560_v2 = vpop.f32.mrb[11].mxu0 }
0x1a83   :  { %v1227_v45 = vmax.f32 %v1224_v20, 0.0 }
0x1a85   :  { %1594 = vmatmul.mubr.f32.vlgmr.msra.gmra.mrb[10].mxu1 %v1227_v45 }
0x1b58   :  { %v1298_v0 = vpop.f32.mrb[10].mxu1 }
0x1b59   :  { %v1299_v9 = vadd.f32 %v1331_v46, %v1298_v0  ;;  %v1595_v47 = vpop.f32.mrb[11].mxu1 }
0x1b5b   :  { %1302 = vst [vmem:[#allocation5] sm:$0x3] %v1299_v9 }
0x1b5c   :  { %1809 = shalt.err (!%p1806_p12)
}
0x1b5d   :  { %s1810_s7 = scalar_lea.hbm %s2102_s3, 32 }
0x1b5e   :  { %p1811_p13 = scmp.ne.s32.totalorder %s2102_s3, %s1810_s7  ;;  %p1814_p0 = scmp.lt.u32.totalorder %s1810_s7, %s2102_s3 }
0x1b60   :  { %p1816_p1 = pnand %p1814_p0, %p1811_p13 }
0x1b62   :  { %1819 = shalt.err (!%p1816_p1)
}
0x1b63   :  { %1312 = dma.vmem_to_hbm [thread:$0]  %s1310_s30, 32, %s2102_s3, [#allocation4]  }
0x1b64   :  { %1822 = dma.done.wait [#allocation4], 32  }
0x1b65   :  { %1823 = vsyncadd [#allocation4], 4294967264 }
0x1b66   :  { %1316 = vsyncpa [#allocation3], 1 }
0x1b67   :  { %1317 = vsyncpa [#allocation4], 1 }

</bundles_post_ra>
